<compile_context>
chip_gen: v7x
topology: tpu7x:2x2x1
jax: 0.10.0
libtpu: 0.0.40
codegen_flags: <defaults>
</compile_context>

<pallas_src>
import jax
import jax.numpy as jnp
from jax.experimental import pallas as pl
from jax.experimental.pallas import tpu as pltpu

IN_FEATURES = 2
OUT_FEATURES = 1


def _round_up(x: int, m: int) -> int:
    return ((x + m - 1) // m) * m


def _linear_kernel(params_ref, x_ref, o_ref):
    # params_ref: SMEM (3,) f32 -> [w0, w1, b]
    # x_ref:      VMEM (2, TR, L) -> feature-major, sublane+lane dense slab
    # o_ref:      VMEM (TR, L)    -> dense output slab
    w0 = params_ref[0]
    w1 = params_ref[1]
    b = params_ref[2]
    o_ref[...] = (w0 * x_ref[0] + w1 * x_ref[1] + b).astype(o_ref.dtype)


def linear_forward(x, weight, bias, *, block_rows=512, lanes=1024,
                   min_pallas_batch=16384, use_pallas=None,
                   x_feature_major=False):
    """Forward pass of nn.Linear(2, 1).

    x: (B, 2) by default, or (2, B) if x_feature_major=True.
    weight: (1, 2); bias: (1,). Returns (B, 1).
    """
    assert weight.shape == (OUT_FEATURES, IN_FEATURES)
    assert bias.shape == (OUT_FEATURES,)
    if x_feature_major:
        assert x.shape[0] == IN_FEATURES
        B = x.shape[1]
    else:
        assert x.shape[1] == IN_FEATURES
        B = x.shape[0]

    if use_pallas is None:
        use_pallas = B >= min_pallas_batch
    if not use_pallas:
        # Small-batch path: a fused XLA op beats kernel launch + layout
        # plumbing at these sizes (review item: dispatch small B to XLA).
        xr = x.T if x_feature_major else x
        return (xr @ weight.T + bias).astype(x.dtype)

    assert lanes > 0 and lanes % 128 == 0, "lanes must be a multiple of 128"
    assert block_rows > 0 and block_rows % 8 == 0, "block_rows must be a multiple of 8"

    L = lanes
    nrows = pl.cdiv(B, L)
    if nrows > block_rows:
        tr = block_rows
    elif nrows >= 16:
        # Enough work for >= 2 grid steps: lets the "parallel" axis shard
        # across both TensorCores on v7x instead of collapsing to one step.
        tr = _round_up(pl.cdiv(nrows, 2), 8)
    else:
        tr = _round_up(nrows, 8)
    grid = pl.cdiv(nrows, tr)
    nrows_p = grid * tr
    bp = nrows_p * L

    # Feature-major, padded, dense slab: (2, rows, L).
    # (x.T is one extra HBM pass; skipped when the caller is feature-major.)
    xt = x if x_feature_major else x.T            # (2, B)
    if bp != B:
        xt = jnp.pad(xt, ((0, 0), (0, bp - B)))
    x3 = xt.reshape(IN_FEATURES, nrows_p, L)

    # [w0, w1, b] as three SMEM scalars (broadcast for free on the VPU).
    params = jnp.concatenate(
        [weight.reshape(-1), bias.reshape(-1)]).astype(jnp.float32)  # (3,)

    y2 = pl.pallas_call(
        _linear_kernel,
        out_shape=jax.ShapeDtypeStruct((nrows_p, L), x.dtype),
        grid=(grid,),
        in_specs=[
            pl.BlockSpec(memory_space=pltpu.MemorySpace.SMEM),
            pl.BlockSpec((IN_FEATURES, tr, L), lambda i: (0, i, 0)),
        ],
        out_specs=pl.BlockSpec((tr, L), lambda i: (i, 0)),
        compiler_params=pltpu.CompilerParams(
            dimension_semantics=("parallel",),
            vmem_limit_bytes=32 * 1024 * 1024,
        ),
    )(params, x3)

    # Padded tail rows hold `bias`; slice them off before the final reshape.
    return y2.reshape(-1)[:B].reshape(B, OUT_FEATURES)


if __name__ == "__main__":
    key = jax.random.PRNGKey(0)
    kx, kw, kb, kx2 = jax.random.split(key, 4)

    # Deterministic init mimicking nn.Linear default
    # (uniform in [-1/sqrt(in_features), 1/sqrt(in_features)]).
    bound = 1.0 / (IN_FEATURES ** 0.5)
    weight = jax.random.uniform(
        kw, (OUT_FEATURES, IN_FEATURES), jnp.float32, -bound, bound)
    bias = jax.random.uniform(
        kb, (OUT_FEATURES,), jnp.float32, -bound, bound)

    # 1) Small batch through the Pallas kernel (forced) and through the
    #    small-batch XLA dispatch path.
    batch = 8
    x = jax.random.normal(kx, (batch, IN_FEATURES), jnp.float32)
    y_ref = x @ weight.T + bias

    y = jax.block_until_ready(linear_forward(x, weight, bias, use_pallas=True))
    assert y.shape == (batch, OUT_FEATURES)
    assert jnp.allclose(y, y_ref, atol=1e-5), "Pallas mismatch (batch=8)"

    y_xla = jax.block_until_ready(linear_forward(x, weight, bias))
    assert jnp.allclose(y_xla, y_ref, atol=1e-5), "XLA-path mismatch (batch=8)"

    # 2) Padded, multi-step, pipelined "parallel" grid (small tiles so the
    #    multi-block path is exercised without a huge test input).
    batch2 = 3000
    x2 = jax.random.normal(kx2, (batch2, IN_FEATURES), jnp.float32)
    y2_ref = x2 @ weight.T + bias
    y2 = jax.block_until_ready(
        linear_forward(x2, weight, bias, use_pallas=True,
                       block_rows=8, lanes=128))
    assert y2.shape == (batch2, OUT_FEATURES)
    assert jnp.allclose(y2, y2_ref, atol=1e-5), "Pallas mismatch (batch=3000)"

    # 3) Feature-major fast path (no wrapper transpose), default big tiles.
    y3 = jax.block_until_ready(
        linear_forward(x2.T, weight, bias, use_pallas=True,
                       x_feature_major=True))
    assert y3.shape == (batch2, OUT_FEATURES)
    assert jnp.allclose(y3, y2_ref, atol=1e-5), "feature-major path mismatch"

    print("KERNEL_OK")
</pallas_src>

<mosaic_0001>
module attributes {stable_mosaic.version = 11 : i64} {
  func.func @_linear_kernel(%arg0: i32, %arg1: memref<3xf32, #tpu.memory_space<smem>>, %arg2: memref<2x8x1024xf32, #tpu.memory_space<vmem>>, %arg3: memref<8x1024xf32, #tpu.memory_space<vmem>>) attributes {dimension_semantics = [#tpu.dimension_semantics<parallel>], iteration_bounds = array<i64: 1>, scalar_prefetch = 0 : i64, scratch_operands = 0 : i64, tpu.core_type = #tpu.core_type<tc>, window_params = [{transform_indices = @transform_0, window_bounds = array<i64: 3>}, {transform_indices = @transform_1, window_bounds = array<i64: 2, 8, 1024>}, {transform_indices = @transform_2, window_bounds = array<i64: 8, 1024>}]} {
    %c0 = arith.constant 0 : index
    %0 = memref.load %arg1[%c0] : memref<3xf32, #tpu.memory_space<smem>>
    %c1 = arith.constant 1 : index
    %1 = memref.load %arg1[%c1] : memref<3xf32, #tpu.memory_space<smem>>
    %c2 = arith.constant 2 : index
    %2 = memref.load %arg1[%c2] : memref<3xf32, #tpu.memory_space<smem>>
    %c0_0 = arith.constant 0 : index
    %c0_1 = arith.constant 0 : index
    %c0_2 = arith.constant 0 : index
    %3 = vector.load %arg2[%c0_0, %c0_1, %c0_2] : memref<2x8x1024xf32, #tpu.memory_space<vmem>>, vector<1x8x1024xf32>
    %4 = vector.shape_cast %3 : vector<1x8x1024xf32> to vector<8x1024xf32>
    %5 = vector.broadcast %0 : f32 to vector<8x1024xf32>
    %6 = arith.mulf %5, %4 : vector<8x1024xf32>
    %c1_3 = arith.constant 1 : index
    %c0_4 = arith.constant 0 : index
    %c0_5 = arith.constant 0 : index
    %7 = vector.load %arg2[%c1_3, %c0_4, %c0_5] : memref<2x8x1024xf32, #tpu.memory_space<vmem>>, vector<1x8x1024xf32>
    %8 = vector.shape_cast %7 : vector<1x8x1024xf32> to vector<8x1024xf32>
    %9 = vector.broadcast %1 : f32 to vector<8x1024xf32>
    %10 = arith.mulf %9, %8 : vector<8x1024xf32>
    %11 = arith.addf %6, %10 : vector<8x1024xf32>
    %12 = vector.broadcast %2 : f32 to vector<8x1024xf32>
    %13 = arith.addf %11, %12 : vector<8x1024xf32>
    %c0_6 = arith.constant 0 : index
    %c0_7 = arith.constant 0 : index
    %14 = vector.load %arg3[%c0_6, %c0_7] : memref<8x1024xf32, #tpu.memory_space<vmem>>, vector<8x1024xf32>
    tpu.vector_store %arg3[%c0_6, %c0_7], %13 {strides = array<i32>} : memref<8x1024xf32, #tpu.memory_space<vmem>>, vector<8x1024xf32>,
    return
  }
  func.func @transform_0(%arg0: i32) -> i32 {
    %c0_i32 = arith.constant 0 : i32
    %c0_i32_0 = arith.constant 0 : i32
    return %c0_i32 : i32
  }
  func.func @transform_1(%arg0: i32) -> (i32, i32, i32) {
    %c0_i32 = arith.constant 0 : i32
    %c0_i32_0 = arith.constant 0 : i32
    %c0_i32_1 = arith.constant 0 : i32
    return %c0_i32, %arg0, %c0_i32_0 : i32, i32, i32
  }
  func.func @transform_2(%arg0: i32) -> (i32, i32) {
    %c0_i32 = arith.constant 0 : i32
    %c0_i32_0 = arith.constant 0 : i32
    return %arg0, %c0_i32 : i32, i32
  }
}

</mosaic_0001>

<bundles_post_ra>
// kernel: tpu_custom_call.1
= control target key start
LH: loop header
LB: loop body
LE: loop exit
PB: predicated region body
PF: predicated region fallthrough
CT: control target
= control target key end

     0   :  { %7 = vsyncpa [#allocation5], 0  ;;  %s239_s0 = inlined_call_operand.hbm [shape: f32[3], index: 0, kind: input, shape index: {}]   ;;  %s240_s1 = inlined_call_operand.hbm [shape: f32[2,8,1024], index: 1, kind: input, shape index: {}]   ;;  %s241_s2 = inlined_call_operand.hbm [shape: f32[8,1024], index: 2, kind: output, shape index: {}]  }
   0x1   :  { %8 = vsyncpa [#allocation3], 0 }
   0x2   :  { %9 = vsyncpa [#allocation4], 0  ;;  %s123_s11 = scalar_lea.hbm %s239_s0, 16 }
   0x3   :  { %p124_p0 = scmp.ne.s32.totalorder %s239_s0, %s123_s11  ;;  %p127_p1 = scmp.lt.u32.totalorder %s123_s11, %s239_s0 }
   0x5   :  { %p129_p2 = pnand %p127_p1, %p124_p0 }
   0x7   :  { %132 = shalt.err (!%p129_p2)
}
   0x8   :  { %s183_s16 = smov [#allocation2]   ;;  %s184_s19 = smov [#allocation6]  }
   0x9   :  { %17 = dma.hbm_to_smem %s239_s0, 16, %s183_s16, [#allocation5]  }
   0xa   :  { %s23_s20 = sshll.u32 %s184_s19, 4  ;;  %s133_s23 = scalar_lea.hbm %s240_s1, 2048  ;;  %s24_s20 = int_to_ptr.vmem [resolvable:$true] %s23_s20 }
   0xb   :  { %p134_p3 = scmp.ne.s32.totalorder %s240_s1, %s133_s23  ;;  %p137_p4 = scmp.lt.u32.totalorder %s133_s23, %s240_s1 }
   0xd   :  { %p139_p5 = pnand %p137_p4, %p134_p3 }
   0xf   :  { %142 = shalt.err (!%p139_p5)
}
  0x10   :  { %s143_s28 = scalar_lea.vmem %s24_s20, 2048  ;;  %p148_p7 = scmp.lt.s32.totalorder %s24_s20, %s24_s20 }
  0x11   :  { %p144_p6 = scmp.ne.s32.totalorder %s24_s20, %s143_s28  ;;  %p149_p8 = scmp.lt.s32.totalorder %s143_s28, %s143_s28 }
  0x13   :  { %p150_p9 = por %p149_p8, %p148_p7 }
  0x15   :  { %p151_p10 = pnand %p150_p9, %p144_p6 }
  0x17   :  { %154 = shalt.err (!%p151_p10)
}
  0x18   :  { %s185_s0 = smov 1024   ;;  %s186_s29 = smov 64  }
  0x19   :  { %29 = dma.hbm_to_vmem [thread:$0]  %s240_s1, 2048, %s24_s20, [#allocation3], %s185_s0, %s185_s0, %s186_s29  }
  0x1a   :  { %177 = dma.done.wait [#allocation5], 16  }
  0x1b   :  { %178 = vsyncadd [#allocation5], 4294967280 }
  0x1c   :  { %179 = dma.done.wait [#allocation3], 2048  }
  0x1d   :  { %180 = vsyncadd [#allocation3], 4294965248 }
  0x1e   :  { %36 = sfence }
  0x1f   :  { %s37_s4 = sld [smem:[#allocation2]]  ;;  %s116_s5 = sld [smem:[#allocation2 + $0x1]]  ;;  %v40_v0 = vld [vmem:[#allocation6] sm:$0xff]  ;;  %v41_v2 = vld [vmem:[#allocation6 + $0x8] sm:$0xff]  ;;  %v42_v4 = vld [vmem:[#allocation6 + $0x10] sm:$0xff] }
  0x20   :  { %s117_s6 = sld [smem:[#allocation2 + $0x2]]  ;;  %v58_v1 = vld [vmem:[#allocation6 + $0x40] sm:$0xff]  ;;  %v59_v3 = vld [vmem:[#allocation6 + $0x48] sm:$0xff]  ;;  %v60_v5 = vld [vmem:[#allocation6 + $0x50] sm:$0xff]  ;;  %s187_s1 = smov [#allocation7]  }
  0x21   :  { %v43_v6 = vld [vmem:[#allocation6 + $0x18] sm:$0xff]  ;;  %v44_v10 = vld [vmem:[#allocation6 + $0x20] sm:$0xff]  ;;  %v45_v16 = vld [vmem:[#allocation6 + $0x28] sm:$0xff]  ;;  %s106_s7 = sshll.u32 %s187_s1, 4  ;;  %s107_s7 = int_to_ptr.vmem [resolvable:$true] %s106_s7 }
  0x22   :  { %v61_v9 = vld [vmem:[#allocation6 + $0x58] sm:$0xff]  ;;  %v62_v11 = vld [vmem:[#allocation6 + $0x60] sm:$0xff]  ;;  %v63_v17 = vld [vmem:[#allocation6 + $0x68] sm:$0xff]  ;;  %s155_s8 = scalar_lea.vmem %s107_s7, 1024  ;;  %p160_p12 = scmp.lt.s32.totalorder %s107_s7, %s107_s7 }
  0x23   :  { %v46_v22 = vld [vmem:[#allocation6 + $0x30] sm:$0xff]  ;;  %v47_v32 = vld [vmem:[#allocation6 + $0x38] sm:$0xff]  ;;  %p156_p11 = scmp.ne.s32.totalorder %s107_s7, %s155_s8  ;;  %p161_p13 = scmp.lt.s32.totalorder %s155_s8, %s155_s8 }
  0x24   :  { %v64_v27 = vld [vmem:[#allocation6 + $0x70] sm:$0xff]  ;;  %v65_v33 = vld [vmem:[#allocation6 + $0x78] sm:$0xff] }
  0x25   :  { %v48_v7 = vstv %s37_s4  ;;  %v66_v8 = vstv %s116_s5  ;;  %p162_p0 = por %p161_p13, %p160_p12 }
  0x26   :  { %v49_v12 = vmul.f32 %v48_v7, %v40_v0  ;;  %v67_v13 = vmul.f32 %v66_v8, %v58_v1  ;;  %v83_v14 = vstv %s117_s6  ;;  %v50_v15 = vmul.f32 %v48_v7, %v41_v2 }
  0x27   :  { %v68_v18 = vmul.f32 %v66_v8, %v59_v3  ;;  %v51_v19 = vmul.f32 %v48_v7, %v42_v4  ;;  %v69_v20 = vmul.f32 %v66_v8, %v60_v5  ;;  %v52_v21 = vmul.f32 %v48_v7, %v43_v6  ;;  %p163_p1 = pnand %p162_p0, %p156_p11 }
  0x28   :  { %v75_v23 = vadd.f32 %v67_v13, %v49_v12  ;;  %v70_v24 = vmul.f32 %v66_v8, %v61_v9  ;;  %v53_v25 = vmul.f32 %v48_v7, %v44_v10  ;;  %v71_v26 = vmul.f32 %v66_v8, %v62_v11 }
  0x29   :  { %v76_v28 = vadd.f32 %v68_v18, %v50_v15  ;;  %v77_v29 = vadd.f32 %v69_v20, %v51_v19  ;;  %v54_v30 = vmul.f32 %v48_v7, %v45_v16  ;;  %v72_v31 = vmul.f32 %v66_v8, %v63_v17 }
  0x2a   :  { %v84_v34 = vadd.f32 %v83_v14, %v75_v23  ;;  %v78_v35 = vadd.f32 %v70_v24, %v52_v21  ;;  %v79_v36 = vadd.f32 %v71_v26, %v53_v25  ;;  %v55_v37 = vmul.f32 %v48_v7, %v46_v22 }
  0x2b   :  { %v85_v38 = vadd.f32 %v83_v14, %v76_v28  ;;  %v86_v39 = vadd.f32 %v83_v14, %v77_v29  ;;  %v80_v40 = vadd.f32 %v72_v31, %v54_v30  ;;  %v73_v41 = vmul.f32 %v66_v8, %v64_v27 }
  0x2c   :  { %92 = vst [vmem:[#allocation7] sm:$0xff] %v84_v34  ;;  %v87_v42 = vadd.f32 %v83_v14, %v78_v35  ;;  %v88_v43 = vadd.f32 %v83_v14, %v79_v36  ;;  %v56_v44 = vmul.f32 %v48_v7, %v47_v32  ;;  %v74_v45 = vmul.f32 %v66_v8, %v65_v33 }
  0x2d   :  { %93 = vst [vmem:[#allocation7 + $0x8] sm:$0xff] %v85_v38  ;;  %94 = vst [vmem:[#allocation7 + $0x10] sm:$0xff] %v86_v39  ;;  %v89_v46 = vadd.f32 %v83_v14, %v80_v40  ;;  %v81_v47 = vadd.f32 %v73_v41, %v55_v37 }
  0x2e   :  { %95 = vst [vmem:[#allocation7 + $0x18] sm:$0xff] %v87_v42  ;;  %96 = vst [vmem:[#allocation7 + $0x20] sm:$0xff] %v88_v43  ;;  %v82_v48 = vadd.f32 %v74_v45, %v56_v44 }
  0x2f   :  { %97 = vst [vmem:[#allocation7 + $0x28] sm:$0xff] %v89_v46  ;;  %v90_v49 = vadd.f32 %v83_v14, %v81_v47 }
  0x30   :  { %v91_v50 = vadd.f32 %v83_v14, %v82_v48 }
  0x31   :  { %98 = vst [vmem:[#allocation7 + $0x30] sm:$0xff] %v90_v49 }
  0x32   :  { %99 = vst [vmem:[#allocation7 + $0x38] sm:$0xff] %v91_v50 }
  0x33   :  { %166 = shalt.err (!%p163_p1)
}
  0x34   :  { %s167_s11 = scalar_lea.hbm %s241_s2, 1024 }
  0x35   :  { %p168_p2 = scmp.ne.s32.totalorder %s241_s2, %s167_s11  ;;  %p171_p3 = scmp.lt.u32.totalorder %s167_s11, %s241_s2 }
  0x37   :  { %p173_p4 = pnand %p171_p3, %p168_p2 }
  0x39   :  { %176 = shalt.err (!%p173_p4)
}
  0x3a   :  { %109 = dma.vmem_to_hbm [thread:$0]  %s107_s7, 1024, %s241_s2, [#allocation4]  }
  0x3b   :  { %181 = dma.done.wait [#allocation4], 1024  }
  0x3c   :  { %182 = vsyncadd [#allocation4], 4294966272 }
  0x3d   :  { %113 = vsyncpa [#allocation3], 1 }
  0x3e   :  { %114 = vsyncpa [#allocation4], 1 }
  0x3f   :  { %115 = vsyncpa [#allocation5], 1 }

</bundles_post_ra>
